<compile_context>
chip_gen: v7x
topology: tpu7x:2x2x1
jax: 0.10.0
libtpu: 0.0.40
codegen_flags: <defaults>
</compile_context>

<pallas_src>
import functools

import numpy as np
import jax
import jax.numpy as jnp
from jax.experimental import pallas as pl
from jax.experimental.pallas import tpu as pltpu

FC1_DIM = 1024
FC2_DIM = 128
FC3_DIM = 128

LANE = 128        # TPU lane width (last-dim alignment)
SUBLANE = 8       # f32 sublane pack (second-to-last-dim alignment)
TM_TARGET = 512   # preferred batch-tile rows for large batches
NUM_TC = 2        # v7x has 2 TensorCores; even-grid choice is harmless on v5e/v6e


def _round_up(n, m):
    return ((n + m - 1) // m) * m


def _choose_tiling(batch, tm_target=TM_TARGET):
    """Pick (padded_batch, tile_rows).

    Small batches: one full-batch block padded only to the sublane pack
    (avoids the 16x MXU/DMA waste of padding B=8 up to a 128/512-row tile).
    Large batches: ~tm_target-row tiles with an even grid length so the batch
    axis shards across both v7x TensorCores via dimension_semantics.
    """
    b_min = _round_up(max(batch, 1), SUBLANE)
    if b_min <= tm_target:
        return b_min, b_min
    n_tiles = -(-b_min // tm_target)                  # ceil div
    if n_tiles % NUM_TC:
        n_tiles += NUM_TC - (n_tiles % NUM_TC)        # even grid for 2 TCs
    tm = _round_up(-(-b_min // n_tiles), SUBLANE)
    return tm * n_tiles, tm


def _mlp_kernel(x_ref, w1_ref, b1_ref, w2_ref, b2_ref,
                w3_ref, b3_ref, w4_ref, b4_ref, o_ref):
    cdt = w1_ref.dtype  # compute dtype (bf16 or f32); accumulation stays f32
    # fc1 + relu   (dropout = identity in eval mode); x is cast per-tile here
    # instead of in the wrapper (saves a whole-array HBM round trip).
    h = jnp.dot(x_ref[...].astype(cdt), w1_ref[...],
                preferred_element_type=jnp.float32)
    h = jnp.maximum(h + b1_ref[...], 0.0)
    # fc2 + relu
    h = jnp.dot(h.astype(cdt), w2_ref[...], preferred_element_type=jnp.float32)
    h = jnp.maximum(h + b2_ref[...], 0.0)
    # fc3 + relu
    h = jnp.dot(h.astype(cdt), w3_ref[...], preferred_element_type=jnp.float32)
    h = jnp.maximum(h + b3_ref[...], 0.0)
    # fc4 (no activation); output columns zero-padded to a multiple of 128
    h = jnp.dot(h.astype(cdt), w4_ref[...], preferred_element_type=jnp.float32)
    o_ref[...] = (h + b4_ref[...]).astype(o_ref.dtype)


def prepare_params(params, *, compute_dtype=jnp.bfloat16):
    """One-time weight prep, hoisted out of the per-call path.

    * w4/b4 zero-padded so output stores are full (unmasked) 128-wide vst's.
    * w1 rows zero-padded so the fc1 contraction dim is lane/MXU aligned.
    * Weights cast to compute_dtype (halves weight DMA at bf16); biases stay
      f32 so the bias-add / ReLU epilogue runs in f32 on the accumulator.
    Returns (prepped_pytree, num_classes).
    """
    w1, b1 = params["w1"], params["b1"]
    w2, b2 = params["w2"], params["b2"]
    w3, b3 = params["w3"], params["b3"]
    w4, b4 = params["w4"], params["b4"]
    num_classes = w4.shape[1]
    d_in = w1.shape[0]
    d_pad = _round_up(d_in, LANE)
    n_pad = _round_up(num_classes, LANE)
    w1p = jnp.pad(w1, ((0, d_pad - d_in), (0, 0)))
    w4p = jnp.pad(w4, ((0, 0), (0, n_pad - num_classes)))
    b4p = jnp.pad(b4, ((0, 0), (0, n_pad - num_classes)))
    prepped = {
        "w1": w1p.astype(compute_dtype), "b1": b1.astype(jnp.float32),
        "w2": w2.astype(compute_dtype),  "b2": b2.astype(jnp.float32),
        "w3": w3.astype(compute_dtype),  "b3": b3.astype(jnp.float32),
        "w4": w4p.astype(compute_dtype), "b4": b4p.astype(jnp.float32),
    }
    return prepped, num_classes


@functools.partial(jax.jit, static_argnames=("num_classes", "tm_target"))
def mlp_forward(x, prepped, *, num_classes, tm_target=TM_TARGET):
    """x: (B, C, H, W). prepped: output of prepare_params."""
    B = x.shape[0]
    x_flat = x.reshape(B, -1).astype(jnp.float32)     # torch.flatten(x, 1)
    d_in = x_flat.shape[1]

    d_pad, d1 = prepped["w1"].shape
    d2 = prepped["w2"].shape[1]
    d3 = prepped["w3"].shape[1]
    n_pad = prepped["w4"].shape[1]

    b_pad, tm = _choose_tiling(B, tm_target)
    # x stays f32 in HBM; padded rows/cols are zeros (sliced off at the end).
    x_p = jnp.pad(x_flat, ((0, b_pad - B), (0, d_pad - d_in)))

    grid = (b_pad // tm,)
    row = lambda i: (i, 0)      # x / out: tiled along batch
    const = lambda i: (0, 0)    # weights / biases: resident across grid steps
    # Fetched once, never rotated -> single buffer instead of default double.
    resident = dict(index_map=const, pipeline_mode=pl.Buffered(1))

    in_specs = [
        pl.BlockSpec((tm, d_pad), row),
        pl.BlockSpec((d_pad, d1), **resident), pl.BlockSpec((1, d1), **resident),
        pl.BlockSpec((d1, d2), **resident), pl.BlockSpec((1, d2), **resident),
        pl.BlockSpec((d2, d3), **resident), pl.BlockSpec((1, d3), **resident),
        pl.BlockSpec((d3, n_pad), **resident), pl.BlockSpec((1, n_pad), **resident),
    ]
    out_spec = pl.BlockSpec((tm, n_pad), row)

    # VMEM budget: single-buffered resident weights + double-buffered f32
    # x/out tiles + f32 intermediates + headroom.  Far below v7x's 64 MiB.
    cbytes = jnp.dtype(prepped["w1"].dtype).itemsize
    weight_bytes = (d_pad * d1 + d1 * d2 + d2 * d3 + d3 * n_pad) * cbytes
    bias_bytes = (d1 + d2 + d3 + n_pad) * 4
    vmem_bytes = int(weight_bytes + bias_bytes
                     + 2 * tm * d_pad * 4           # double-buffered x tiles
                     + 2 * tm * n_pad * 4           # double-buffered out tiles
                     + 6 * tm * d1 * 4              # f32 intermediates / slack
                     + (8 << 20))                   # headroom
    vmem_bytes = min(vmem_bytes, 48 << 20)

    flops = 2 * b_pad * (d_pad * d1 + d1 * d2 + d2 * d3 + d3 * n_pad)
    bytes_accessed = int(b_pad * d_pad * 4 + weight_bytes + bias_bytes
                         + b_pad * n_pad * 4)

    out = pl.pallas_call(
        _mlp_kernel,
        out_shape=jax.ShapeDtypeStruct((b_pad, n_pad), jnp.float32),
        grid_spec=pltpu.PrefetchScalarGridSpec(
            num_scalar_prefetch=0,
            grid=grid,
            in_specs=in_specs,
            out_specs=out_spec,
        ),
        compiler_params=pltpu.CompilerParams(
            dimension_semantics=("parallel",),   # batch axis across TCs (v7x)
            vmem_limit_bytes=vmem_bytes,
        ),
        cost_estimate=pl.CostEstimate(
            flops=flops, transcendentals=0, bytes_accessed=bytes_accessed),
    )(x_p, prepped["w1"], prepped["b1"], prepped["w2"], prepped["b2"],
      prepped["w3"], prepped["b3"], prepped["w4"], prepped["b4"])

    return out[:B, :num_classes]


def init_params(key, input_dim, num_classes):
    """Deterministic init mimicking nn.Linear defaults (uniform +/- 1/sqrt(fan_in))."""
    dims = [(input_dim, FC1_DIM), (FC1_DIM, FC2_DIM),
            (FC2_DIM, FC3_DIM), (FC3_DIM, num_classes)]
    params = {}
    for i, (fan_in, fan_out) in enumerate(dims, start=1):
        key, kw, kb = jax.random.split(key, 3)
        bound = 1.0 / np.sqrt(fan_in)
        # stored already transposed: (in_features, out_features)
        params[f"w{i}"] = jax.random.uniform(
            kw, (fan_in, fan_out), jnp.float32, -bound, bound)
        params[f"b{i}"] = jax.random.uniform(
            kb, (1, fan_out), jnp.float32, -bound, bound)
    return params


def reference_forward(x, params, compute_dtype=jnp.float32):
    """Pure-JAX reference mirroring the kernel's cast/accumulate dtypes."""
    cdt = compute_dtype
    h = x.reshape(x.shape[0], -1).astype(jnp.float32).astype(cdt)
    h = jnp.maximum(jnp.dot(h, params["w1"].astype(cdt),
                            preferred_element_type=jnp.float32) + params["b1"], 0.0)
    h = jnp.maximum(jnp.dot(h.astype(cdt), params["w2"].astype(cdt),
                            preferred_element_type=jnp.float32) + params["b2"], 0.0)
    h = jnp.maximum(jnp.dot(h.astype(cdt), params["w3"].astype(cdt),
                            preferred_element_type=jnp.float32) + params["b3"], 0.0)
    return jnp.dot(h.astype(cdt), params["w4"].astype(cdt),
                   preferred_element_type=jnp.float32) + params["b4"]


if __name__ == "__main__":
    # data_config analogue: input_dims=(1, 16, 16) -> input_dim=256, 10 classes.
    C, H, W = 1, 16, 16
    input_dim = C * H * W
    num_classes = 10

    key = jax.random.PRNGKey(0)
    key, kx_small, kx_big = jax.random.split(key, 3)
    params = init_params(key, input_dim, num_classes)

    # One-time weight prep (pad / cast hoisted out of the per-call path).
    prepped_bf16, nc = prepare_params(params, compute_dtype=jnp.bfloat16)
    prepped_f32, _ = prepare_params(params, compute_dtype=jnp.float32)

    # Small batch: single sublane-padded block (no tile-padding waste), bf16 path.
    x_small = jax.random.normal(kx_small, (8, C, H, W), jnp.float32)
    out_bf16 = jax.block_until_ready(
        mlp_forward(x_small, prepped_bf16, num_classes=nc))
    ref_bf16 = reference_forward(x_small, params, compute_dtype=jnp.bfloat16)
    np.testing.assert_allclose(np.asarray(out_bf16), np.asarray(ref_bf16),
                               rtol=2e-2, atol=2e-2)

    # f32 path on the small batch: exact PyTorch (eval-mode) semantics.
    out_f32 = jax.block_until_ready(
        mlp_forward(x_small, prepped_f32, num_classes=nc))
    ref_f32 = reference_forward(x_small, params, compute_dtype=jnp.float32)
    np.testing.assert_allclose(np.asarray(out_f32), np.asarray(ref_f32),
                               rtol=1e-5, atol=1e-5)

    # Larger ragged batch: exercises the multi-tile path with an even grid.
    x_big = jax.random.normal(kx_big, (1000, C, H, W), jnp.float32)
    out_big = jax.block_until_ready(
        mlp_forward(x_big, prepped_bf16, num_classes=nc))
    ref_big = reference_forward(x_big, params, compute_dtype=jnp.bfloat16)
    np.testing.assert_allclose(np.asarray(out_big), np.asarray(ref_big),
                               rtol=2e-2, atol=2e-2)

    print("KERNEL_OK")
</pallas_src>

<mosaic_0001>
module attributes {stable_mosaic.version = 11 : i64} {
  func.func @_mlp_kernel(%arg0: i32, %arg1: memref<8x256xf32, #tpu.memory_space<vmem>>, %arg2: memref<256x1024xbf16, #tpu.memory_space<vmem>>, %arg3: memref<1x1024xf32, #tpu.memory_space<vmem>>, %arg4: memref<1024x128xbf16, #tpu.memory_space<vmem>>, %arg5: memref<1x128xf32, #tpu.memory_space<vmem>>, %arg6: memref<128x128xbf16, #tpu.memory_space<vmem>>, %arg7: memref<1x128xf32, #tpu.memory_space<vmem>>, %arg8: memref<128x128xbf16, #tpu.memory_space<vmem>>, %arg9: memref<1x128xf32, #tpu.memory_space<vmem>>, %arg10: memref<8x128xf32, #tpu.memory_space<vmem>>) attributes {dimension_semantics = [#tpu.dimension_semantics<parallel>], iteration_bounds = array<i64: 1>, scalar_prefetch = 0 : i64, scratch_operands = 0 : i64, tpu.core_type = #tpu.core_type<tc>, window_params = [{transform_indices = @transform_0, window_bounds = array<i64: 8, 256>}, {pipeline_mode = #tpu.pipeline_mode<synchronous>, transform_indices = @transform_1, window_bounds = array<i64: 256, 1024>}, {pipeline_mode = #tpu.pipeline_mode<synchronous>, transform_indices = @transform_2, window_bounds = array<i64: 1, 1024>}, {pipeline_mode = #tpu.pipeline_mode<synchronous>, transform_indices = @transform_3, window_bounds = array<i64: 1024, 128>}, {pipeline_mode = #tpu.pipeline_mode<synchronous>, transform_indices = @transform_4, window_bounds = array<i64: 1, 128>}, {pipeline_mode = #tpu.pipeline_mode<synchronous>, transform_indices = @transform_5, window_bounds = array<i64: 128, 128>}, {pipeline_mode = #tpu.pipeline_mode<synchronous>, transform_indices = @transform_6, window_bounds = array<i64: 1, 128>}, {pipeline_mode = #tpu.pipeline_mode<synchronous>, transform_indices = @transform_7, window_bounds = array<i64: 128, 128>}, {pipeline_mode = #tpu.pipeline_mode<synchronous>, transform_indices = @transform_8, window_bounds = array<i64: 1, 128>}, {transform_indices = @transform_9, window_bounds = array<i64: 8, 128>}]} {
    %c0 = arith.constant 0 : index
    %c0_0 = arith.constant 0 : index
    %0 = vector.load %arg1[%c0, %c0_0] : memref<8x256xf32, #tpu.memory_space<vmem>>, vector<8x256xf32>
    %1 = arith.truncf %0 : vector<8x256xf32> to vector<8x256xbf16>
    %c0_1 = arith.constant 0 : index
    %c0_2 = arith.constant 0 : index
    %2 = vector.load %arg2[%c0_1, %c0_2] : memref<256x1024xbf16, #tpu.memory_space<vmem>>, vector<256x1024xbf16>
    %cst = arith.constant dense<0.000000e+00> : vector<8x1024xf32>
    %3 = tpu.matmul %1, %2, %cst {dimension_numbers = #tpu.dot_dimension_numbers<[1], [0], [0], [1], [0, 0, 1, 1], [], []>} : vector<8x256xbf16>, vector<256x1024xbf16>, vector<8x1024xf32> -> vector<8x1024xf32>
    %c0_3 = arith.constant 0 : index
    %c0_4 = arith.constant 0 : index
    %4 = vector.load %arg3[%c0_3, %c0_4] : memref<1x1024xf32, #tpu.memory_space<vmem>>, vector<1x1024xf32>
    %5 = vector.broadcast %4 : vector<1x1024xf32> to vector<8x1024xf32>
    %6 = arith.addf %3, %5 : vector<8x1024xf32>
    %cst_5 = arith.constant 0.000000e+00 : f32
    %7 = vector.broadcast %cst_5 : f32 to vector<8x1024xf32>
    %8 = arith.maximumf %6, %7 : vector<8x1024xf32>
    %9 = arith.truncf %8 : vector<8x1024xf32> to vector<8x1024xbf16>
    %c0_6 = arith.constant 0 : index
    %c0_7 = arith.constant 0 : index
    %10 = vector.load %arg4[%c0_6, %c0_7] : memref<1024x128xbf16, #tpu.memory_space<vmem>>, vector<1024x128xbf16>
    %cst_8 = arith.constant dense<0.000000e+00> : vector<8x128xf32>
    %11 = tpu.matmul %9, %10, %cst_8 {dimension_numbers = #tpu.dot_dimension_numbers<[1], [0], [0], [1], [0, 0, 1, 1], [], []>} : vector<8x1024xbf16>, vector<1024x128xbf16>, vector<8x128xf32> -> vector<8x128xf32>
    %c0_9 = arith.constant 0 : index
    %c0_10 = arith.constant 0 : index
    %12 = vector.load %arg5[%c0_9, %c0_10] : memref<1x128xf32, #tpu.memory_space<vmem>>, vector<1x128xf32>
    %13 = vector.broadcast %12 : vector<1x128xf32> to vector<8x128xf32>
    %14 = arith.addf %11, %13 : vector<8x128xf32>
    %cst_11 = arith.constant 0.000000e+00 : f32
    %15 = vector.broadcast %cst_11 : f32 to vector<8x128xf32>
    %16 = arith.maximumf %14, %15 : vector<8x128xf32>
    %17 = arith.truncf %16 : vector<8x128xf32> to vector<8x128xbf16>
    %c0_12 = arith.constant 0 : index
    %c0_13 = arith.constant 0 : index
    %18 = vector.load %arg6[%c0_12, %c0_13] : memref<128x128xbf16, #tpu.memory_space<vmem>>, vector<128x128xbf16>
    %cst_14 = arith.constant dense<0.000000e+00> : vector<8x128xf32>
    %19 = tpu.matmul %17, %18, %cst_14 {dimension_numbers = #tpu.dot_dimension_numbers<[1], [0], [0], [1], [0, 0, 1, 1], [], []>} : vector<8x128xbf16>, vector<128x128xbf16>, vector<8x128xf32> -> vector<8x128xf32>
    %c0_15 = arith.constant 0 : index
    %c0_16 = arith.constant 0 : index
    %20 = vector.load %arg7[%c0_15, %c0_16] : memref<1x128xf32, #tpu.memory_space<vmem>>, vector<1x128xf32>
    %21 = vector.broadcast %20 : vector<1x128xf32> to vector<8x128xf32>
    %22 = arith.addf %19, %21 : vector<8x128xf32>
    %cst_17 = arith.constant 0.000000e+00 : f32
    %23 = vector.broadcast %cst_17 : f32 to vector<8x128xf32>
    %24 = arith.maximumf %22, %23 : vector<8x128xf32>
    %25 = arith.truncf %24 : vector<8x128xf32> to vector<8x128xbf16>
    %c0_18 = arith.constant 0 : index
    %c0_19 = arith.constant 0 : index
    %26 = vector.load %arg8[%c0_18, %c0_19] : memref<128x128xbf16, #tpu.memory_space<vmem>>, vector<128x128xbf16>
    %cst_20 = arith.constant dense<0.000000e+00> : vector<8x128xf32>
    %27 = tpu.matmul %25, %26, %cst_20 {dimension_numbers = #tpu.dot_dimension_numbers<[1], [0], [0], [1], [0, 0, 1, 1], [], []>} : vector<8x128xbf16>, vector<128x128xbf16>, vector<8x128xf32> -> vector<8x128xf32>
    %c0_21 = arith.constant 0 : index
    %c0_22 = arith.constant 0 : index
    %28 = vector.load %arg9[%c0_21, %c0_22] : memref<1x128xf32, #tpu.memory_space<vmem>>, vector<1x128xf32>
    %29 = vector.broadcast %28 : vector<1x128xf32> to vector<8x128xf32>
    %30 = arith.addf %27, %29 : vector<8x128xf32>
    %c0_23 = arith.constant 0 : index
    %c0_24 = arith.constant 0 : index
    %31 = vector.load %arg10[%c0_23, %c0_24] : memref<8x128xf32, #tpu.memory_space<vmem>>, vector<8x128xf32>
    tpu.vector_store %arg10[%c0_23, %c0_24], %30 {strides = array<i32>} : memref<8x128xf32, #tpu.memory_space<vmem>>, vector<8x128xf32>,
    return
  }
  func.func @transform_0(%arg0: i32) -> (i32, i32) {
    %c0_i32 = arith.constant 0 : i32
    %c0_i32_0 = arith.constant 0 : i32
    return %arg0, %c0_i32 : i32, i32
  }
  func.func @transform_1(%arg0: i32) -> (i32, i32) {
    %c0_i32 = arith.constant 0 : i32
    %c0_i32_0 = arith.constant 0 : i32
    %c0_i32_1 = arith.constant 0 : i32
    return %c0_i32, %c0_i32_0 : i32, i32
  }
  func.func @transform_2(%arg0: i32) -> (i32, i32) {
    %c0_i32 = arith.constant 0 : i32
    %c0_i32_0 = arith.constant 0 : i32
    %c0_i32_1 = arith.constant 0 : i32
    return %c0_i32, %c0_i32_0 : i32, i32
  }
  func.func @transform_3(%arg0: i32) -> (i32, i32) {
    %c0_i32 = arith.constant 0 : i32
    %c0_i32_0 = arith.constant 0 : i32
    %c0_i32_1 = arith.constant 0 : i32
    return %c0_i32, %c0_i32_0 : i32, i32
  }
  func.func @transform_4(%arg0: i32) -> (i32, i32) {
    %c0_i32 = arith.constant 0 : i32
    %c0_i32_0 = arith.constant 0 : i32
    %c0_i32_1 = arith.constant 0 : i32
    return %c0_i32, %c0_i32_0 : i32, i32
  }
  func.func @transform_5(%arg0: i32) -> (i32, i32) {
    %c0_i32 = arith.constant 0 : i32
    %c0_i32_0 = arith.constant 0 : i32
    %c0_i32_1 = arith.constant 0 : i32
    return %c0_i32, %c0_i32_0 : i32, i32
  }
  func.func @transform_6(%arg0: i32) -> (i32, i32) {
    %c0_i32 = arith.constant 0 : i32
    %c0_i32_0 = arith.constant 0 : i32
    %c0_i32_1 = arith.constant 0 : i32
    return %c0_i32, %c0_i32_0 : i32, i32
  }
  func.func @transform_7(%arg0: i32) -> (i32, i32) {
    %c0_i32 = arith.constant 0 : i32
    %c0_i32_0 = arith.constant 0 : i32
    %c0_i32_1 = arith.constant 0 : i32
    return %c0_i32, %c0_i32_0 : i32, i32
  }
  func.func @transform_8(%arg0: i32) -> (i32, i32) {
    %c0_i32 = arith.constant 0 : i32
    %c0_i32_0 = arith.constant 0 : i32
    %c0_i32_1 = arith.constant 0 : i32
    return %c0_i32, %c0_i32_0 : i32, i32
  }
  func.func @transform_9(%arg0: i32) -> (i32, i32) {
    %c0_i32 = arith.constant 0 : i32
    %c0_i32_0 = arith.constant 0 : i32
    return %arg0, %c0_i32 : i32, i32
  }
}

</mosaic_0001>

<bundles_post_ra>
// kernel: mlp_forward.1
= control target key start
LH: loop header
LB: loop body
LE: loop exit
PB: predicated region body
PF: predicated region fallthrough
CT: control target
= control target key end

     0   :  { %14 = vsyncpa [#allocation3], 0  ;;  %s2707_s0 = inlined_call_operand.vmem [shape: f32[8,256], index: 0, kind: input, shape index: {}]   ;;  %s2708_s1 = inlined_call_operand.hbm [shape: bf16[256,1024], index: 1, kind: input, shape index: {}]   ;;  %s2709_s2 = inlined_call_operand.vmem [shape: f32[1,1024], index: 2, kind: input, shape index: {}]   ;;  %s2710_s3 = inlined_call_operand.hbm [shape: bf16[1024,128], index: 3, kind: input, shape index: {}]   ;;  %s2711_s4 = inlined_call_operand.vmem [shape: f32[1,128], index: 4, kind: input, shape index: {}]   ;;  %s2712_s5 = inlined_call_operand.vmem [shape: bf16[128,128], index: 5, kind: input, shape index: {}]   ;;  %s2713_s6 = inlined_call_operand.vmem [shape: f32[1,128], index: 6, kind: input, shape index: {}]   ;;  %s2714_s7 = inlined_call_operand.vmem [shape: bf16[128,128], index: 7, kind: input, shape index: {}]   ;;  %s2715_s8 = inlined_call_operand.vmem [shape: f32[1,128], index: 8, kind: input, shape index: {}]   ;;  %s2716_s9 = inlined_call_operand.hbm [shape: f32[8,128], index: 9, kind: output, shape index: {}]  }
   0x1   :  { %15 = vsyncpa [#allocation6], 0 }
   0x2   :  { %16 = vsyncpa [#allocation4], 0  ;;  %s2496_s30 = smov [#allocation2]   ;;  %s2424_s13 = scalar_lea.hbm %s2708_s1, 16384 }
   0x3   :  { %s24_s10 = sshll.u32 %s2496_s30, 4  ;;  %p2425_p0 = scmp.ne.s32.totalorder %s2708_s1, %s2424_s13  ;;  %s25_s10 = int_to_ptr.vmem [resolvable:$true] %s24_s10 }
   0x4   :  { %p2428_p1 = scmp.lt.u32.totalorder %s2424_s13, %s2708_s1 }
   0x6   :  { %p2430_p2 = pnand %p2428_p1, %p2425_p0 }
   0x8   :  { %2433 = shalt.err (!%p2430_p2)
}
   0x9   :  { %s2434_s18 = scalar_lea.vmem %s25_s10, 16384  ;;  %p2439_p4 = scmp.lt.s32.totalorder %s25_s10, %s25_s10 }
   0xa   :  { %p2435_p3 = scmp.ne.s32.totalorder %s25_s10, %s2434_s18  ;;  %p2440_p5 = scmp.lt.s32.totalorder %s2434_s18, %s2434_s18 }
   0xc   :  { %p2441_p6 = por %p2440_p5, %p2439_p4 }
   0xe   :  { %p2442_p7 = pnand %p2441_p6, %p2435_p3 }
  0x10   :  { %2445 = shalt.err (!%p2442_p7)
}
  0x11   :  { %s2497_s19 = smov 512   ;;  %s2498_s20 = smov 32  }
  0x12   :  { %30 = dma.hbm_to_vmem [thread:$0]  %s2708_s1, 16384, %s25_s10, [#allocation3], %s2497_s19, %s2497_s19, %s2498_s20  }
  0x13   :  { %s2499_s23 = smov [#allocation5]   ;;  %s2446_s27 = scalar_lea.hbm %s2710_s3, 8192 }
  0x14   :  { %s38_s24 = sshll.u32 %s2499_s23, 4  ;;  %p2447_p8 = scmp.ne.s32.totalorder %s2710_s3, %s2446_s27  ;;  %s39_s24 = int_to_ptr.vmem [resolvable:$true] %s38_s24 }
  0x15   :  { %p2450_p9 = scmp.lt.u32.totalorder %s2446_s27, %s2710_s3 }
  0x17   :  { %p2452_p10 = pnand %p2450_p9, %p2447_p8 }
  0x19   :  { %2455 = shalt.err (!%p2452_p10)
}
  0x1a   :  { %s2456_s12 = scalar_lea.vmem %s39_s24, 8192  ;;  %p2461_p12 = scmp.lt.s32.totalorder %s39_s24, %s39_s24 }
  0x1b   :  { %p2457_p11 = scmp.ne.s32.totalorder %s39_s24, %s2456_s12  ;;  %p2462_p13 = scmp.lt.s32.totalorder %s2456_s12, %s2456_s12 }
  0x1d   :  { %p2463_p0 = por %p2462_p13, %p2461_p12 }
  0x1f   :  { %p2464_p1 = pnand %p2463_p0, %p2457_p11 }
  0x21   :  { %2467 = shalt.err (!%p2464_p1)
}
  0x22   :  { %s2500_s1 = smov 64   ;;  %s2501_s10 = smov 4  }
  0x23   :  { %44 = dma.hbm_to_vmem [thread:$0]  %s2710_s3, 8192, %s39_s24, [#allocation6], %s2500_s1, %s2500_s1, %s2501_s10  }
  0x24   :  { %2490 = dma.done.wait [#allocation3], 16384  }
  0x25   :  { %2491 = vsyncadd [#allocation3], 4294950912 }
  0x26   :  { %2492 = dma.done.wait [#allocation6], 8192  }
  0x27   :  { %2493 = vsyncadd [#allocation6], 4294959104  ;;  %v66_v0 = vld [vmem:[#allocation2] sm:$0xff]  ;;  %v67_v2 = vld [vmem:[#allocation2 + $0x8] sm:$0xff]  ;;  %vm2503_vm0 = vmmov 0   ;;  %s2504_s29 = smov [#allocation7]  }
  0x28   :  { %v70_v1 = vld [vmem:[#allocation2 + $0x20] sm:$0xff]  ;;  %v71_v4 = vld [vmem:[#allocation2 + $0x28] sm:$0xff]  ;;  %s1968_s30 = sshll.u32 %s2504_s29, 4  ;;  %s1969_s30 = int_to_ptr.vmem [resolvable:$true] %s1968_s30 }
  0x29   :  { %v1979_v3 = vcombine.high %v66_v0, %v70_v1  ;;  %v1978_v5 = vcombine.low %v66_v0, %v70_v1  ;;  %v74_v6 = vld [vmem:[#allocation2 + $0x40] sm:$0xff]  ;;  %v1981_v8 = vcombine.high %v67_v2, %v71_v4  ;;  %v1980_v9 = vcombine.low %v67_v2, %v71_v4  ;;  %v75_v11 = vld [vmem:[#allocation2 + $0x48] sm:$0xff]  ;;  %p2473_p3 = scmp.lt.s32.totalorder %s1969_s30, %s1969_s30 }
  0x2a   :  { %v78_v7 = vld [vmem:[#allocation2 + $0x60] sm:$0xff]  ;;  %v79_v12 = vld [vmem:[#allocation2 + $0x68] sm:$0xff] }
  0x2b   :  { %v1987_v10 = vcombine.high %v74_v6, %v78_v7  ;;  %v82_v13 = vld [vmem:[#allocation2 + $0x80] sm:$0xff]  ;;  %876 = vmatprep.subr.bf16.mxu0 %v1979_v3  ;;  %v1989_v14 = vcombine.high %v75_v11, %v79_v12  ;;  %v83_v16 = vld [vmem:[#allocation2 + $0x88] sm:$0xff]  ;;  %917 = vmatprep.subr.bf16.mxu1 %v1981_v8  ;;  %v1986_v18 = vcombine.low %v74_v6, %v78_v7 }
  0x2c   :  { %v86_v15 = vld [vmem:[#allocation2 + $0xa0] sm:$0xff]  ;;  %v87_v17 = vld [vmem:[#allocation2 + $0xa8] sm:$0xff]  ;;  %877 = vmatpush1.bf16.msra.mxu0 %v1978_v5  ;;  %918 = vmatpush1.bf16.msra.mxu1 %v1980_v9  ;;  %v1988_v19 = vcombine.low %v75_v11, %v79_v12 }
  0x2d   :  { %878 = vmatprep.subr.bf16.mxu0 %v1987_v10  ;;  %v1995_v20 = vcombine.high %v82_v13, %v86_v15  ;;  %919 = vmatprep.subr.bf16.mxu1 %v1989_v14  ;;  %v1997_v21 = vcombine.high %v83_v16, %v87_v17  ;;  %v90_v22 = vld [vmem:[#allocation2 + $0xc0] sm:$0xff]  ;;  %v91_v24 = vld [vmem:[#allocation2 + $0xc8] sm:$0xff]  ;;  %v1994_v26 = vcombine.low %v82_v13, %v86_v15 }
  0x2e   :  { %v94_v23 = vld [vmem:[#allocation2 + $0xe0] sm:$0xff]  ;;  %v95_v25 = vld [vmem:[#allocation2 + $0xe8] sm:$0xff]  ;;  %v1996_v27 = vcombine.low %v83_v16, %v87_v17 }
  0x2f   :  { %v2003_v28 = vcombine.high %v90_v22, %v94_v23  ;;  %v2005_v29 = vcombine.high %v91_v24, %v95_v25  ;;  %v98_v30 = vld [vmem:[#allocation2 + $0x100] sm:$0xff]  ;;  %v99_v32 = vld [vmem:[#allocation2 + $0x108] sm:$0xff]  ;;  %v2002_v34 = vcombine.low %v90_v22, %v94_v23  ;;  %v2004_v35 = vcombine.low %v91_v24, %v95_v25 }
  0x30   :  { %879 = vmatpush1.bf16.msra.mxu0 %v1986_v18  ;;  %920 = vmatpush1.bf16.msra.mxu1 %v1988_v19  ;;  %v102_v31 = vld [vmem:[#allocation2 + $0x120] sm:$0xff]  ;;  %v103_v33 = vld [vmem:[#allocation2 + $0x128] sm:$0xff] }
  0x31   :  { %880 = vmatprep.subr.bf16.mxu0 %v1995_v20  ;;  %921 = vmatprep.subr.bf16.mxu1 %v1997_v21  ;;  %v2011_v36 = vcombine.high %v98_v30, %v102_v31  ;;  %v2013_v37 = vcombine.high %v99_v32, %v103_v33  ;;  %v106_v38 = vld [vmem:[#allocation2 + $0x140] sm:$0xff]  ;;  %v107_v40 = vld [vmem:[#allocation2 + $0x148] sm:$0xff]  ;;  %v2010_v42 = vcombine.low %v98_v30, %v102_v31 }
  0x32   :  { %v110_v39 = vld [vmem:[#allocation2 + $0x160] sm:$0xff]  ;;  %v111_v41 = vld [vmem:[#allocation2 + $0x168] sm:$0xff]  ;;  %v2012_v43 = vcombine.low %v99_v32, %v103_v33 }
  0x33   :  { %v2019_v44 = vcombine.high %v106_v38, %v110_v39  ;;  %v2021_v45 = vcombine.high %v107_v40, %v111_v41  ;;  %v114_v46 = vld [vmem:[#allocation2 + $0x180] sm:$0xff]  ;;  %v115_v48 = vld [vmem:[#allocation2 + $0x188] sm:$0xff]  ;;  %v2018_v50 = vcombine.low %v106_v38, %v110_v39  ;;  %v2020_v51 = vcombine.low %v107_v40, %v111_v41 }
  0x34   :  { %881 = vmatpush1.bf16.msra.mxu0 %v1994_v26  ;;  %922 = vmatpush1.bf16.msra.mxu1 %v1996_v27  ;;  %v118_v47 = vld [vmem:[#allocation2 + $0x1a0] sm:$0xff]  ;;  %v119_v49 = vld [vmem:[#allocation2 + $0x1a8] sm:$0xff] }
  0x35   :  { %882 = vmatprep.subr.bf16.mxu0 %v2003_v28  ;;  %923 = vmatprep.subr.bf16.mxu1 %v2005_v29  ;;  %v2027_v52 = vcombine.high %v114_v46, %v118_v47  ;;  %v63_v53 = vld [vmem:[%s2707_s0 + $0x8] sm:$0xff]  ;;  %v2029_v54 = vcombine.high %v115_v48, %v119_v49  ;;  %v122_v55 = vld [vmem:[#allocation2 + $0x1c0] sm:$0xff]  ;;  %v2026_v60 = vcombine.low %v114_v46, %v118_v47 }
  0x36   :  { %v126_v56 = vld [vmem:[#allocation2 + $0x1e0] sm:$0xff]  ;;  %v2582_v57 = vpack.c.bf16 %v63_v53, %v63_v53  ;;  %v123_v58 = vld [vmem:[#allocation2 + $0x1c8] sm:$0xff]  ;;  %v2028_v61 = vcombine.low %v115_v48, %v119_v49 }
  0x37   :  { %v127_v59 = vld [vmem:[#allocation2 + $0x1e8] sm:$0xff]  ;;  %v2035_v62 = vcombine.high %v122_v55, %v126_v56  ;;  %v130_v0 = vld [vmem:[#allocation2 + $0x200] sm:$0xff]  ;;  %v2034_v4 = vcombine.low %v122_v55, %v126_v56 }
  0x38   :  { %883 = vmatpush1.bf16.msra.mxu0 %v2002_v34  ;;  %924 = vmatpush1.bf16.msra.mxu1 %v2004_v35  ;;  %v2037_v63 = vcombine.high %v123_v58, %v127_v59  ;;  %v134_v1 = vld [vmem:[#allocation2 + $0x220] sm:$0xff]  ;;  %v131_v2 = vld [vmem:[#allocation2 + $0x208] sm:$0xff]  ;;  %v2036_v5 = vcombine.low %v123_v58, %v127_v59 }
  0x39   :  { %884 = vmatprep.subr.bf16.mxu0 %v2011_v36  ;;  %925 = vmatprep.subr.bf16.mxu1 %v2013_v37  ;;  %v135_v3 = vld [vmem:[#allocation2 + $0x228] sm:$0xff]  ;;  %v2043_v6 = vcombine.high %v130_v0, %v134_v1  ;;  %v138_v8 = vld [vmem:[#allocation2 + $0x240] sm:$0xff]  ;;  %v2042_v12 = vcombine.low %v130_v0, %v134_v1  ;;  %v72_v1 = vld [vmem:[#allocation2 + $0x30] sm:$0xff] }
  0x3a   :  { %908 = vmatprep.mubr.bf16.mxu0 %v2582_v57  ;;  %949 = vmatprep.mubr.bf16.mxu1 %v2582_v57  ;;  %v2045_v7 = vcombine.high %v131_v2, %v135_v3  ;;  %v142_v9 = vld [vmem:[#allocation2 + $0x260] sm:$0xff]  ;;  %v139_v10 = vld [vmem:[#allocation2 + $0x248] sm:$0xff]  ;;  %v2044_v13 = vcombine.low %v131_v2, %v135_v3 }
  0x3b   :  { %v143_v11 = vld [vmem:[#allocation2 + $0x268] sm:$0xff]  ;;  %v2051_v14 = vcombine.high %v138_v8, %v142_v9  ;;  %v146_v16 = vld [vmem:[#allocation2 + $0x280] sm:$0xff]  ;;  %v2050_v20 = vcombine.low %v138_v8, %v142_v9 }
  0x3c   :  { %885 = vmatpush1.bf16.msra.mxu0 %v2010_v42  ;;  %926 = vmatpush1.bf16.msra.mxu1 %v2012_v43  ;;  %v2053_v15 = vcombine.high %v139_v10, %v143_v11  ;;  %v150_v17 = vld [vmem:[#allocation2 + $0x2a0] sm:$0xff]  ;;  %v147_v18 = vld [vmem:[#allocation2 + $0x288] sm:$0xff]  ;;  %v2052_v21 = vcombine.low %v139_v10, %v143_v11  ;;  %v80_v10 = vld [vmem:[#allocation2 + $0x70] sm:$0xff] }
  0x3d   :  { %886 = vmatprep.subr.bf16.mxu0 %v2019_v44  ;;  %927 = vmatprep.subr.bf16.mxu1 %v2021_v45  ;;  %v151_v19 = vld [vmem:[#allocation2 + $0x2a8] sm:$0xff]  ;;  %v2059_v22 = vcombine.high %v146_v16, %v150_v17  ;;  %v154_v24 = vld [vmem:[#allocation2 + $0x2c0] sm:$0xff]  ;;  %v2058_v28 = vcombine.low %v146_v16, %v150_v17 }
  0x3e   :  { %v2061_v23 = vcombine.high %v147_v18, %v151_v19  ;;  %v158_v25 = vld [vmem:[#allocation2 + $0x2e0] sm:$0xff]  ;;  %v155_v26 = vld [vmem:[#allocation2 + $0x2c8] sm:$0xff]  ;;  %v2060_v29 = vcombine.low %v147_v18, %v151_v19  ;;  %v84_v18 = vld [vmem:[#allocation2 + $0x90] sm:$0xff] }
  0x3f   :  { %v159_v27 = vld [vmem:[#allocation2 + $0x2e8] sm:$0xff]  ;;  %v2067_v30 = vcombine.high %v154_v24, %v158_v25  ;;  %v162_v32 = vld [vmem:[#allocation2 + $0x300] sm:$0xff]  ;;  %v2066_v36 = vcombine.low %v154_v24, %v158_v25  ;;  %v92_v24 = vld [vmem:[#allocation2 + $0xd0] sm:$0xff] }
  0x40   :  { %887 = vmatpush1.bf16.msra.mxu0 %v2018_v50  ;;  %928 = vmatpush1.bf16.msra.mxu1 %v2020_v51  ;;  %v2069_v31 = vcombine.high %v155_v26, %v159_v27  ;;  %v166_v33 = vld [vmem:[#allocation2 + $0x320] sm:$0xff]  ;;  %v163_v34 = vld [vmem:[#allocation2 + $0x308] sm:$0xff]  ;;  %v2068_v38 = vcombine.low %v155_v26, %v159_v27  ;;  %v96_v25 = vld [vmem:[#allocation2 + $0xf0] sm:$0xff] }
  0x41   :  { %888 = vmatprep.subr.bf16.mxu0 %v2027_v52  ;;  %929 = vmatprep.subr.bf16.mxu1 %v2029_v54  ;;  %v167_v35 = vld [vmem:[#allocation2 + $0x328] sm:$0xff]  ;;  %v170_v37 = vld [vmem:[#allocation2 + $0x340] sm:$0xff]  ;;  %v2075_v39 = vcombine.high %v162_v32, %v166_v33  ;;  %v2074_v44 = vcombine.low %v162_v32, %v166_v33  ;;  %v100_v32 = vld [vmem:[#allocation2 + $0x110] sm:$0xff] }
  0x42   :  { %v174_v40 = vld [vmem:[#allocation2 + $0x360] sm:$0xff]  ;;  %v2077_v41 = vcombine.high %v163_v34, %v167_v35  ;;  %v171_v42 = vld [vmem:[#allocation2 + $0x348] sm:$0xff]  ;;  %v2076_v46 = vcombine.low %v163_v34, %v167_v35  ;;  %v104_v33 = vld [vmem:[#allocation2 + $0x130] sm:$0xff]  ;;  %v2007_v35 = vcombine.high %v92_v24, %v96_v25 }
  0x43   :  { %v175_v43 = vld [vmem:[#allocation2 + $0x368] sm:$0xff]  ;;  %v178_v45 = vld [vmem:[#allocation2 + $0x380] sm:$0xff]  ;;  %v2083_v47 = vcombine.high %v170_v37, %v174_v40  ;;  %v2082_v52 = vcombine.low %v170_v37, %v174_v40  ;;  %v105_v37 = vld [vmem:[#allocation2 + $0x138] sm:$0xff] }
  0x44   :  { %889 = vmatpush1.bf16.msra.mxu0 %v2026_v60  ;;  %930 = vmatpush1.bf16.msra.mxu1 %v2028_v61  ;;  %v182_v48 = vld [vmem:[#allocation2 + $0x3a0] sm:$0xff]  ;;  %v2085_v49 = vcombine.high %v171_v42, %v175_v43  ;;  %v179_v50 = vld [vmem:[#allocation2 + $0x388] sm:$0xff]  ;;  %v2084_v54 = vcombine.low %v171_v42, %v175_v43  ;;  %v108_v40 = vld [vmem:[#allocation2 + $0x150] sm:$0xff] }
  0x45   :  { %890 = vmatprep.subr.bf16.mxu0 %v2035_v62  ;;  %931 = vmatprep.subr.bf16.mxu1 %v2037_v63  ;;  %v183_v51 = vld [vmem:[#allocation2 + $0x3a8] sm:$0xff]  ;;  %v186_v53 = vld [vmem:[#allocation2 + $0x3c0] sm:$0xff]  ;;  %v2091_v55 = vcombine.high %v178_v45, %v182_v48  ;;  %v2090_v61 = vcombine.low %v178_v45, %v182_v48  ;;  %v68_v62 = vld [vmem:[#allocation2 + $0x10] sm:$0xff] }
  0x46   :  { %v190_v56 = vld [vmem:[#allocation2 + $0x3e0] sm:$0xff]  ;;  %v2093_v58 = vcombine.high %v179_v50, %v183_v51  ;;  %v187_v59 = vld [vmem:[#allocation2 + $0x3c8] sm:$0xff]  ;;  %v2092_v63 = vcombine.low %v179_v50, %v183_v51  ;;  %v1983_v9 = vcombine.high %v68_v62, %v72_v1  ;;  %v109_v43 = vld [vmem:[#allocation2 + $0x158] sm:$0xff] }
  0x47   :  { %v191_v60 = vld [vmem:[#allocation2 + $0x3e8] sm:$0xff]  ;;  %v2099_v0 = vcombine.high %v186_v53, %v190_v56  ;;  %v62_v3 = vld [vmem:[%s2707_s0] sm:$0xff]  ;;  %v120_v48 = vld [vmem:[#allocation2 + $0x1b0] sm:$0xff] }
  0x48   :  { %891 = vmatpush1.bf16.msra.mxu0 %v2034_v4  ;;  %932 = vmatpush1.bf16.msra.mxu1 %v2036_v5  ;;  %v2101_v2 = vcombine.high %v187_v59, %v191_v60  ;;  %v69_v4 = vld [vmem:[#allocation2 + $0x18] sm:$0xff]  ;;  %v2100_v8 = vcombine.low %v187_v59, %v191_v60 }
  0x49   :  { %892 = vmatprep.subr.bf16.mxu0 %v2043_v6  ;;  %933 = vmatprep.subr.bf16.mxu1 %v2045_v7  ;;  %v73_v5 = vld [vmem:[#allocation2 + $0x38] sm:$0xff]  ;;  %v2098_v6 = vcombine.low %v186_v53, %v190_v56  ;;  %v76_v7 = vld [vmem:[#allocation2 + $0x50] sm:$0xff] }
  0x4a   :  { %v1985_v11 = vcombine.high %v69_v4, %v73_v5  ;;  %v1984_v16 = vcombine.low %v69_v4, %v73_v5  ;;  %v1991_v17 = vcombine.high %v76_v7, %v80_v10  ;;  %v117_v51 = vld [vmem:[#allocation2 + $0x198] sm:$0xff]  ;;  %v128_v56 = vld [vmem:[#allocation2 + $0x1f0] sm:$0xff] }
  0x4b   :  { %v125_v60 = vld [vmem:[#allocation2 + $0x1d8] sm:$0xff] }
  0x4c   :  { %893 = vmatpush1.bf16.msra.mxu0 %v2042_v12  ;;  %934 = vmatpush1.bf16.msra.mxu1 %v2044_v13  ;;  %v77_v12 = vld [vmem:[#allocation2 + $0x58] sm:$0xff]  ;;  %v2589_v13 = vpack.c.bf16 %v62_v3, %v62_v3 }
  0x4d   :  { %894 = vmatprep.subr.bf16.mxu0 %v2051_v14  ;;  %935 = vmatprep.subr.bf16.mxu1 %v2053_v15  ;;  %v81_v14 = vld [vmem:[#allocation2 + $0x78] sm:$0xff]  ;;  %v1982_v15 = vcombine.low %v68_v62, %v72_v1  ;;  %v136_v1 = vld [vmem:[#allocation2 + $0x230] sm:$0xff] }
  0x4e   :  { %v1993_v19 = vcombine.high %v77_v12, %v81_v14  ;;  %v1992_v26 = vcombine.low %v77_v12, %v81_v14  ;;  %v133_v4 = vld [vmem:[#allocation2 + $0x218] sm:$0xff] }
  0x4f   :  { %v137_v5 = vld [vmem:[#allocation2 + $0x238] sm:$0xff] }
  0x50   :  { %895 = vmatpush1.bf16.msra.mxu0 %v2050_v20  ;;  %936 = vmatpush1.bf16.msra.mxu1 %v2052_v21  ;;  %v88_v20 = vld [vmem:[#allocation2 + $0xb0] sm:$0xff]  ;;  %v85_v21 = vld [vmem:[#allocation2 + $0x98] sm:$0xff] }
  0x51   :  { %896 = vmatprep.subr.bf16.mxu0 %v2059_v22  ;;  %937 = vmatprep.subr.bf16.mxu1 %v2061_v23  ;;  %v89_v22 = vld [vmem:[#allocation2 + $0xb8] sm:$0xff]  ;;  %v1990_v23 = vcombine.low %v76_v7, %v80_v10  ;;  %v1999_v27 = vcombine.high %v84_v18, %v88_v20 }
  0x52   :  { %v2000_v34 = vcombine.low %v85_v21, %v89_v22  ;;  %v141_v12 = vld [vmem:[#allocation2 + $0x258] sm:$0xff] }
  0x53   :  { %v145_v14 = vld [vmem:[#allocation2 + $0x278] sm:$0xff] }
  0x54   :  { %897 = vmatpush1.bf16.msra.mxu0 %v2058_v28  ;;  %938 = vmatpush1.bf16.msra.mxu1 %v2060_v29  ;;  %v93_v28 = vld [vmem:[#allocation2 + $0xd8] sm:$0xff] }
  0x55   :  { %898 = vmatprep.subr.bf16.mxu0 %v2067_v30  ;;  %939 = vmatprep.subr.bf16.mxu1 %v2069_v31  ;;  %v97_v29 = vld [vmem:[#allocation2 + $0xf8] sm:$0xff]  ;;  %v2001_v30 = vcombine.high %v85_v21, %v89_v22  ;;  %v1998_v31 = vcombine.low %v84_v18, %v88_v20  ;;  %v152_v18 = vld [vmem:[#allocation2 + $0x2b0] sm:$0xff] }
  0x56   :  { %v2008_v42 = vcombine.low %v93_v28, %v97_v29  ;;  %v149_v21 = vld [vmem:[#allocation2 + $0x298] sm:$0xff] }
  0x57   :  { %v153_v22 = vld [vmem:[#allocation2 + $0x2b8] sm:$0xff] }
  0x58   :  { %899 = vmatpush1.bf16.msra.mxu0 %v2066_v36  ;;  %940 = vmatpush1.bf16.msra.mxu1 %v2068_v38  ;;  %v101_v36 = vld [vmem:[#allocation2 + $0x118] sm:$0xff]  ;;  %v2009_v38 = vcombine.high %v93_v28, %v97_v29 }
  0x59   :  { %900 = vmatprep.subr.bf16.mxu0 %v2075_v39  ;;  %941 = vmatprep.subr.bf16.mxu1 %v2077_v41  ;;  %v2006_v39 = vcombine.low %v92_v24, %v96_v25  ;;  %v112_v41 = vld [vmem:[#allocation2 + $0x170] sm:$0xff]  ;;  %v2017_v45 = vcombine.high %v101_v36, %v105_v37  ;;  %v157_v29 = vld [vmem:[#allocation2 + $0x2d8] sm:$0xff] }
  0x5a   :  { %v2023_v50 = vcombine.high %v108_v40, %v112_v41  ;;  %v156_v25 = vld [vmem:[#allocation2 + $0x2d0] sm:$0xff] }
  0x5c   :  { %901 = vmatpush1.bf16.msra.mxu0 %v2074_v44  ;;  %942 = vmatpush1.bf16.msra.mxu1 %v2076_v46  ;;  %v113_v44 = vld [vmem:[#allocation2 + $0x178] sm:$0xff]  ;;  %v2014_v46 = vcombine.low %v100_v32, %v104_v33 }
  0x5d   :  { %902 = vmatprep.subr.bf16.mxu0 %v2083_v47  ;;  %943 = vmatprep.subr.bf16.mxu1 %v2085_v49  ;;  %v116_v47 = vld [vmem:[#allocation2 + $0x190] sm:$0xff]  ;;  %v2016_v49 = vcombine.low %v101_v36, %v105_v37  ;;  %v2025_v53 = vcombine.high %v109_v43, %v113_v44 }
  0x5e   :  { %v2031_v59 = vcombine.high %v116_v47, %v120_v48  ;;  %v164_v36 = vld [vmem:[#allocation2 + $0x310] sm:$0xff] }
  0x5f   :  { %v168_v37 = vld [vmem:[#allocation2 + $0x330] sm:$0xff] }
  0x60   :  { %903 = vmatpush1.bf16.msra.mxu0 %v2082_v52  ;;  %944 = vmatpush1.bf16.msra.mxu1 %v2084_v54  ;;  %v121_v52 = vld [vmem:[#allocation2 + $0x1b8] sm:$0xff]  ;;  %v2022_v54 = vcombine.low %v108_v40, %v112_v41 }
  0x61   :  { %904 = vmatprep.subr.bf16.mxu0 %v2091_v55  ;;  %945 = vmatprep.subr.bf16.mxu1 %v2093_v58  ;;  %v124_v55 = vld [vmem:[#allocation2 + $0x1d0] sm:$0xff]  ;;  %v2024_v58 = vcombine.low %v109_v43, %v113_v44  ;;  %v2033_v62 = vcombine.high %v117_v51, %v121_v52 }
  0x62   :  { %v2039_v3 = vcombine.high %v124_v55, %v128_v56  ;;  %v2038_v7 = vcombine.low %v124_v55, %v128_v56  ;;  %v172_v43 = vld [vmem:[#allocation2 + $0x350] sm:$0xff] }
  0x63   :  { %v176_v44 = vld [vmem:[#allocation2 + $0x370] sm:$0xff] }
  0x64   :  { %905 = vmatpush1.bf16.msra.mxu0 %v2090_v61  ;;  %946 = vmatpush1.bf16.msra.mxu1 %v2092_v63  ;;  %v129_v61 = vld [vmem:[#allocation2 + $0x1f8] sm:$0xff]  ;;  %v2030_v63 = vcombine.low %v116_v47, %v120_v48  ;;  %v2078_v47 = vcombine.low %v164_v36, %v168_v37  ;;  %v2086_v55 = vcombine.low %v172_v43, %v176_v44 }
  0x65   :  { %906 = vmatprep.subr.bf16.mxu0 %v2099_v0  ;;  %947 = vmatprep.subr.bf16.mxu1 %v2101_v2  ;;  %v132_v0 = vld [vmem:[#allocation2 + $0x210] sm:$0xff]  ;;  %v2032_v2 = vcombine.low %v117_v51, %v121_v52  ;;  %v2040_v10 = vcombine.low %v125_v60, %v129_v61 }
  0x66   :  { %v180_v51 = vld [vmem:[#allocation2 + $0x390] sm:$0xff] }
  0x67   :  { %v184_v52 = vld [vmem:[#allocation2 + $0x3b0] sm:$0xff] }
  0x68   :  { %907 = vmatpush1.bf16.msra.mxu0 %v2098_v6  ;;  %948 = vmatpush1.bf16.msra.mxu1 %v2100_v8  ;;  %v2041_v6 = vcombine.high %v125_v60, %v129_v61  ;;  %v140_v8 = vld [vmem:[#allocation2 + $0x250] sm:$0xff] }
  0x69   :  { %958 = vmatprep.subr.bf16.mxu0 %v1983_v9  ;;  %999 = vmatprep.subr.bf16.mxu1 %v1985_v11  ;;  %v144_v9 = vld [vmem:[#allocation2 + $0x270] sm:$0xff]  ;;  %v2047_v11 = vcombine.high %v132_v0, %v136_v1 }
  0x6a   :  { %v2055_v20 = vcombine.high %v140_v8, %v144_v9  ;;  %v2054_v24 = vcombine.low %v140_v8, %v144_v9  ;;  %v188_v60 = vld [vmem:[#allocation2 + $0x3d0] sm:$0xff]  ;;  %v2346_v8 = vld [vmem:[#allocation5] sm:$0xff]  }
  0x6b   :  { %909 = vmatmul.mubr.bf16.vlgmr.msra.gmra.mrb[0].mxu0 %v2589_v13  ;;  %950 = vmatmul.mubr.bf16.vlgmr.msra.gmra.mrb[0].mxu1 %v2589_v13  ;;  %v192_v61 = vld [vmem:[#allocation2 + $0x3f0] sm:$0xff]  ;;  %v2347_v9 = vld [vmem:[#allocation5 + $0x80] sm:$0xff]  }
  0x6c   :  { %959 = vmatpush1.bf16.msra.mxu0 %v1982_v15  ;;  %1000 = vmatpush1.bf16.msra.mxu1 %v1984_v16  ;;  %v2049_v15 = vcombine.high %v133_v4, %v137_v5  ;;  %v2046_v16 = vcombine.low %v132_v0, %v136_v1  ;;  %v2094_v0 = vcombine.low %v180_v51, %v184_v52 }
  0x6d   :  { %960 = vmatprep.subr.bf16.mxu0 %v1991_v17  ;;  %1001 = vmatprep.subr.bf16.mxu1 %v1993_v19  ;;  %v148_v17 = vld [vmem:[#allocation2 + $0x290] sm:$0xff]  ;;  %v2048_v19 = vcombine.low %v133_v4, %v137_v5  ;;  %v2102_v4 = vcombine.low %v188_v60, %v192_v61 }
  0x6e   :  { %990 = vmatprep.mubr.bf16.mxu0 %v2582_v57  ;;  %1031 = vmatprep.mubr.bf16.mxu1 %v2582_v57  ;;  %v2015_v57 = vcombine.high %v100_v32, %v104_v33  ;;  %v2063_v28 = vcombine.high %v148_v17, %v152_v18  ;;  %v2062_v32 = vcombine.low %v148_v17, %v152_v18  ;;  %v2354_v17 = vld [vmem:[#allocation5 + $0x10] sm:$0xff]  }
  0x6f   :  { %v2064_v33 = vcombine.low %v149_v21, %v153_v22  ;;  %v2355_v18 = vld [vmem:[#allocation5 + $0x90] sm:$0xff]  }
  0x70   :  { %961 = vmatpush1.bf16.msra.mxu0 %v1990_v23  ;;  %1002 = vmatpush1.bf16.msra.mxu1 %v1992_v26  ;;  %v2057_v23 = vcombine.high %v141_v12, %v145_v14  ;;  %v160_v26 = vld [vmem:[#allocation2 + $0x2f0] sm:$0xff] }
  0x71   :  { %962 = vmatprep.subr.bf16.mxu0 %v1999_v27  ;;  %1003 = vmatprep.subr.bf16.mxu1 %v2001_v30  ;;  %v2056_v27 = vcombine.low %v141_v12, %v145_v14  ;;  %v161_v30 = vld [vmem:[#allocation2 + $0x2f8] sm:$0xff]  ;;  %v2070_v40 = vcombine.low %v156_v25, %v160_v26  ;;  %v2350_v12 = vld [vmem:[#allocation5 + $0x8] sm:$0xff]  }
  0x72   :  { %v2072_v41 = vcombine.low %v157_v29, %v161_v30  ;;  %v2351_v14 = vld [vmem:[#allocation5 + $0x88] sm:$0xff]  }
  0x74   :  { %963 = vmatpush1.bf16.msra.mxu0 %v1998_v31  ;;  %1004 = vmatpush1.bf16.msra.mxu1 %v2000_v34  ;;  %v2065_v31 = vcombine.high %v149_v21, %v153_v22  ;;  %v2071_v34 = vcombine.high %v156_v25, %v160_v26  ;;  %v2358_v21 = vld [vmem:[#allocation5 + $0x18] sm:$0xff]   ;;  %v2360_v22 = vld [vmem:[#allocation5 + $0x60] sm:$0xff]   ;;  %v2364_v26 = vld [vmem:[#allocation5 + $0x68] sm:$0xff]  }
  0x75   :  { %964 = vmatprep.subr.bf16.mxu0 %v2007_v35  ;;  %1005 = vmatprep.subr.bf16.mxu1 %v2009_v38  ;;  %v2073_v35 = vcombine.high %v157_v29, %v161_v30  ;;  %v165_v38 = vld [vmem:[#allocation2 + $0x318] sm:$0xff]  ;;  %v2363_v25 = vld [vmem:[#allocation5 + $0xa0] sm:$0xff]   ;;  %v2367_v29 = vld [vmem:[#allocation5 + $0xa8] sm:$0xff]  }
  0x76   :  { %v2368_v30 = vld [vmem:[#allocation5 + $0x70] sm:$0xff]  }
  0x78   :  { %965 = vmatpush1.bf16.msra.mxu0 %v2006_v39  ;;  %1006 = vmatpush1.bf16.msra.mxu1 %v2008_v42  ;;  %v169_v39 = vld [vmem:[#allocation2 + $0x338] sm:$0xff]  ;;  %v2079_v42 = vcombine.high %v164_v36, %v168_v37 }
  0x79   :  { %966 = vmatprep.subr.bf16.mxu0 %v2015_v57  ;;  %1007 = vmatprep.subr.bf16.mxu1 %v2017_v45  ;;  %v2081_v57 = vcombine.high %v165_v38, %v169_v39  ;;  %v173_v45 = vld [vmem:[#allocation2 + $0x358] sm:$0xff]  ;;  %v2080_v48 = vcombine.low %v165_v38, %v169_v39  ;;  %v2376_v38 = vld [vmem:[#allocation5 + $0x140] sm:$0xff]  }
  0x7a   :  { %v2374_v36 = vld [vmem:[#allocation5 + $0x38] sm:$0xff]   ;;  %v2377_v39 = vld [vmem:[#allocation5 + $0x1c0] sm:$0xff]  }
  0x7b   :  { %v2375_v37 = vld [vmem:[#allocation5 + $0xb8] sm:$0xff]  }
  0x7c   :  { %967 = vmatpush1.bf16.msra.mxu0 %v2014_v46  ;;  %1008 = vmatpush1.bf16.msra.mxu1 %v2016_v49  ;;  %v177_v46 = vld [vmem:[#allocation2 + $0x378] sm:$0xff]  ;;  %v2087_v49 = vcombine.high %v172_v43, %v176_v44 }
  0x7d   :  { %968 = vmatprep.subr.bf16.mxu0 %v2023_v50  ;;  %1009 = vmatprep.subr.bf16.mxu1 %v2025_v53  ;;  %v2089_v50 = vcombine.high %v173_v45, %v177_v46  ;;  %v181_v53 = vld [vmem:[#allocation2 + $0x398] sm:$0xff]  ;;  %v2088_v56 = vcombine.low %v173_v45, %v177_v46 }
  0x80   :  { %969 = vmatpush1.bf16.msra.mxu0 %v2022_v54  ;;  %1010 = vmatpush1.bf16.msra.mxu1 %v2024_v58  ;;  %v185_v54 = vld [vmem:[#allocation2 + $0x3b8] sm:$0xff]  ;;  %v2095_v58 = vcombine.high %v180_v51, %v184_v52 }
  0x81   :  { %970 = vmatprep.subr.bf16.mxu0 %v2031_v59  ;;  %1011 = vmatprep.subr.bf16.mxu1 %v2033_v62  ;;  %v2097_v59 = vcombine.high %v181_v53, %v185_v54  ;;  %v189_v62 = vld [vmem:[#allocation2 + $0x3d8] sm:$0xff]  ;;  %v2096_v1 = vcombine.low %v181_v53, %v185_v54 }
  0x84   :  { %971 = vmatpush1.bf16.msra.mxu0 %v2030_v63  ;;  %1012 = vmatpush1.bf16.msra.mxu1 %v2032_v2  ;;  %v193_v63 = vld [vmem:[#allocation2 + $0x3f8] sm:$0xff]  ;;  %v2103_v2 = vcombine.high %v188_v60, %v192_v61 }
  0x85   :  { %972 = vmatprep.subr.bf16.mxu0 %v2039_v3  ;;  %1013 = vmatprep.subr.bf16.mxu1 %v2041_v6  ;;  %v2105_v3 = vcombine.high %v189_v62, %v193_v63  ;;  %v2104_v5 = vcombine.low %v189_v62, %v193_v63  ;;  %v2344_v6 = vld [vmem:[#allocation5 + $0x40] sm:$0xff]  }
  0x88   :  { %973 = vmatpush1.bf16.msra.mxu0 %v2038_v7  ;;  %1014 = vmatpush1.bf16.msra.mxu1 %v2040_v10  ;;  %v2345_v7 = vld [vmem:[#allocation5 + $0xc0] sm:$0xff]   ;;  %v2348_v10 = vld [vmem:[#allocation5 + $0x48] sm:$0xff]  }
  0x89   :  { %974 = vmatprep.subr.bf16.mxu0 %v2047_v11  ;;  %1015 = vmatprep.subr.bf16.mxu1 %v2049_v15  ;;  %v2349_v11 = vld [vmem:[#allocation5 + $0xc8] sm:$0xff]   ;;  %v2352_v15 = vld [vmem:[#allocation5 + $0x50] sm:$0xff]  }
  0x8c   :  { %975 = vmatpush1.bf16.msra.mxu0 %v2046_v16  ;;  %1016 = vmatpush1.bf16.msra.mxu1 %v2048_v19  ;;  %v2353_v16 = vld [vmem:[#allocation5 + $0xd0] sm:$0xff]   ;;  %v2356_v19 = vld [vmem:[#allocation5 + $0x58] sm:$0xff]  }
  0x8d   :  { %976 = vmatprep.subr.bf16.mxu0 %v2055_v20  ;;  %1017 = vmatprep.subr.bf16.mxu1 %v2057_v23  ;;  %v2357_v20 = vld [vmem:[#allocation5 + $0xd8] sm:$0xff]   ;;  %v2361_v23 = vld [vmem:[#allocation5 + $0xe0] sm:$0xff]  }
  0x90   :  { %977 = vmatpush1.bf16.msra.mxu0 %v2054_v24  ;;  %1018 = vmatpush1.bf16.msra.mxu1 %v2056_v27  ;;  %v2362_v24 = vld [vmem:[#allocation5 + $0x20] sm:$0xff]   ;;  %v2365_v27 = vld [vmem:[#allocation5 + $0xe8] sm:$0xff]  }
  0x91   :  { %978 = vmatprep.subr.bf16.mxu0 %v2063_v28  ;;  %1019 = vmatprep.subr.bf16.mxu1 %v2065_v31  ;;  %v2366_v28 = vld [vmem:[#allocation5 + $0x28] sm:$0xff]   ;;  %v2369_v31 = vld [vmem:[#allocation5 + $0xf0] sm:$0xff]  }
  0x94   :  { %979 = vmatpush1.bf16.msra.mxu0 %v2062_v32  ;;  %1020 = vmatpush1.bf16.msra.mxu1 %v2064_v33  ;;  %v2370_v32 = vld [vmem:[#allocation5 + $0x30] sm:$0xff]  }
  0x95   :  { %980 = vmatprep.subr.bf16.mxu0 %v2071_v34  ;;  %1021 = vmatprep.subr.bf16.mxu1 %v2073_v35  ;;  %v2371_v33 = vld [vmem:[#allocation5 + $0xb0] sm:$0xff]   ;;  %v2372_v34 = vld [vmem:[#allocation5 + $0x78] sm:$0xff]  }
  0x96   :  { %v2373_v35 = vld [vmem:[#allocation5 + $0xf8] sm:$0xff]  }
  0x98   :  { %981 = vmatpush1.bf16.msra.mxu0 %v2070_v40  ;;  %1022 = vmatpush1.bf16.msra.mxu1 %v2072_v41  ;;  %v196_v40 = vlaneseq }
  0x99   :  { %982 = vmatprep.subr.bf16.mxu0 %v2079_v42  ;;  %1023 = vmatprep.subr.bf16.mxu1 %v2081_v57  ;;  %v2603_v57 = vld [vmem:[%s2709_s2] sm:$0xff] }
  0x9a   :  { %v2597_v41 = vshrl.u32 %v196_v40, 7 }
  0x9c   :  { %983 = vmatpush1.bf16.msra.mxu0 %v2078_v47  ;;  %1024 = vmatpush1.bf16.msra.mxu1 %v2080_v48  ;;  %v198_v42 = vsub.s32 0, %v2597_v41  ;;  %v206_v43 = vsub.s32 2, %v2597_v41  ;;  %v202_v44 = vsub.s32 1, %v2597_v41  ;;  %v210_v45 = vsub.s32 3, %v2597_v41 }
  0x9d   :  { %984 = vmatprep.subr.bf16.mxu0 %v2087_v49  ;;  %1025 = vmatprep.subr.bf16.mxu1 %v2089_v50  ;;  %v226_v40 = vsub.s32 7, %v2597_v41 }
  0x9e   :  { %v199_v46 = vrot.slane %v2603_v57, %v198_v42  ;;  %v207_v47 = vrot.slane %v2603_v57, %v206_v43  ;;  %v203_v48 = vrot.slane %v2603_v57, %v202_v44  ;;  %v211_v49 = vrot.slane %v2603_v57, %v210_v45 }
  0x9f   :  { %v227_v45 = vrot.slane %v2603_v57, %v226_v40 }
  0xa0   :  { %985 = vmatpush1.bf16.msra.mxu0 %v2086_v55  ;;  %1026 = vmatpush1.bf16.msra.mxu1 %v2088_v56 }
  0xa1   :  { %986 = vmatprep.subr.bf16.mxu0 %v2095_v58  ;;  %1027 = vmatprep.subr.bf16.mxu1 %v2097_v59 }
  0xa4   :  { %987 = vmatpush1.bf16.msra.mxu0 %v2094_v0  ;;  %1028 = vmatpush1.bf16.msra.mxu1 %v2096_v1 }
  0xa5   :  { %988 = vmatprep.subr.bf16.mxu0 %v2103_v2  ;;  %1029 = vmatprep.subr.bf16.mxu1 %v2105_v3 }
  0xa8   :  { %989 = vmatpush1.bf16.msra.mxu0 %v2102_v4  ;;  %1030 = vmatpush1.bf16.msra.mxu1 %v2104_v5 }
  0xa9   :  { %2189 = vmatprep.subr.bf16.mxu0 %v2344_v6  ;;  %2211 = vmatprep.subr.bf16.mxu1 %v2345_v7  ;;  %v2378_v6 = vld [vmem:[#allocation5 + $0x100] sm:$0xff]  }
  0xab   :  { %991 = vmatmul.mubr.bf16.vlgmr.msra.gmra.mrb[4].mxu0 %v2589_v13  ;;  %1032 = vmatmul.mubr.bf16.vlgmr.msra.gmra.mrb[4].mxu1 %v2589_v13  ;;  %v2359_v13 = vld [vmem:[#allocation5 + $0x98] sm:$0xff]  }
  0xac   :  { %2190 = vmatpush3.bf16.msra.mxu0 %v2346_v8  ;;  %2212 = vmatpush3.bf16.msra.mxu1 %v2347_v9  ;;  %v2379_v8 = vld [vmem:[#allocation5 + $0x180] sm:$0xff]   ;;  %v2380_v9 = vld [vmem:[#allocation5 + $0x148] sm:$0xff]  }
  0xad   :  { %2191 = vmatprep.subr.bf16.mxu0 %v2348_v10  ;;  %2213 = vmatprep.subr.bf16.mxu1 %v2349_v11  ;;  %v2381_v10 = vld [vmem:[#allocation5 + $0x1c8] sm:$0xff]  }
  0xae   :  { %v2382_v11 = vld [vmem:[#allocation5 + $0x108] sm:$0xff]  }
  0xb0   :  { %2192 = vmatpush3.bf16.msra.mxu0 %v2350_v12  ;;  %2214 = vmatpush3.bf16.msra.mxu1 %v2351_v14  ;;  %v2383_v12 = vld [vmem:[#allocation5 + $0x188] sm:$0xff]   ;;  %v2384_v14 = vld [vmem:[#allocation5 + $0x150] sm:$0xff]  }
  0xb1   :  { %2193 = vmatprep.subr.bf16.mxu0 %v2352_v15  ;;  %2215 = vmatprep.subr.bf16.mxu1 %v2353_v16  ;;  %v2385_v15 = vld [vmem:[#allocation5 + $0x1d0] sm:$0xff]  }
  0xb2   :  { %v2386_v16 = vld [vmem:[#allocation5 + $0x110] sm:$0xff]  }
  0xb4   :  { %2194 = vmatpush3.bf16.msra.mxu0 %v2354_v17  ;;  %2216 = vmatpush3.bf16.msra.mxu1 %v2355_v18  ;;  %v2387_v17 = vld [vmem:[#allocation5 + $0x190] sm:$0xff]   ;;  %v2388_v18 = vld [vmem:[#allocation5 + $0x158] sm:$0xff]  }
  0xb5   :  { %2195 = vmatprep.subr.bf16.mxu0 %v2356_v19  ;;  %2217 = vmatprep.subr.bf16.mxu1 %v2357_v20  ;;  %v2389_v19 = vld [vmem:[#allocation5 + $0x1d8] sm:$0xff]  }
  0xb6   :  { %v2390_v20 = vld [vmem:[#allocation5 + $0x118] sm:$0xff]  }
  0xb8   :  { %2196 = vmatpush3.bf16.msra.mxu0 %v2358_v21  ;;  %2218 = vmatpush3.bf16.msra.mxu1 %v2359_v13  ;;  %v2391_v21 = vld [vmem:[#allocation5 + $0x198] sm:$0xff]   ;;  %v2392_v13 = vld [vmem:[#allocation5 + $0x160] sm:$0xff]  }
  0xb9   :  { %2197 = vmatprep.subr.bf16.mxu0 %v2360_v22  ;;  %2219 = vmatprep.subr.bf16.mxu1 %v2361_v23  ;;  %v2393_v22 = vld [vmem:[#allocation5 + $0x1e0] sm:$0xff]  }
  0xba   :  { %v2394_v23 = vld [vmem:[#allocation5 + $0x120] sm:$0xff]  }
  0xbc   :  { %2198 = vmatpush3.bf16.msra.mxu0 %v2362_v24  ;;  %2220 = vmatpush3.bf16.msra.mxu1 %v2363_v25  ;;  %v2395_v24 = vld [vmem:[#allocation5 + $0x1a0] sm:$0xff]   ;;  %v2396_v25 = vld [vmem:[#allocation5 + $0x168] sm:$0xff]  }
  0xbd   :  { %2199 = vmatprep.subr.bf16.mxu0 %v2364_v26  ;;  %2221 = vmatprep.subr.bf16.mxu1 %v2365_v27  ;;  %v2397_v26 = vld [vmem:[#allocation5 + $0x1e8] sm:$0xff]  }
  0xbe   :  { %v2398_v27 = vld [vmem:[#allocation5 + $0x128] sm:$0xff]  }
  0xc0   :  { %2200 = vmatpush3.bf16.msra.mxu0 %v2366_v28  ;;  %2222 = vmatpush3.bf16.msra.mxu1 %v2367_v29  ;;  %v2399_v28 = vld [vmem:[#allocation5 + $0x1a8] sm:$0xff]   ;;  %v2400_v29 = vld [vmem:[#allocation5 + $0x170] sm:$0xff]  }
  0xc1   :  { %2201 = vmatprep.subr.bf16.mxu0 %v2368_v30  ;;  %2223 = vmatprep.subr.bf16.mxu1 %v2369_v31  ;;  %v2401_v30 = vld [vmem:[#allocation5 + $0x1f0] sm:$0xff]  }
  0xc2   :  { %v2402_v31 = vld [vmem:[#allocation5 + $0x130] sm:$0xff]  }
  0xc4   :  { %2202 = vmatpush3.bf16.msra.mxu0 %v2370_v32  ;;  %2224 = vmatpush3.bf16.msra.mxu1 %v2371_v33  ;;  %v2403_v32 = vld [vmem:[#allocation5 + $0x1b0] sm:$0xff]   ;;  %v2404_v33 = vld [vmem:[#allocation5 + $0x178] sm:$0xff]  }
  0xc5   :  { %2203 = vmatprep.subr.bf16.mxu0 %v2372_v34  ;;  %2225 = vmatprep.subr.bf16.mxu1 %v2373_v35  ;;  %v2405_v34 = vld [vmem:[#allocation5 + $0x1f8] sm:$0xff]  }
  0xc6   :  { %v2406_v35 = vld [vmem:[#allocation5 + $0x138] sm:$0xff]  }
  0xc8   :  { %2204 = vmatpush3.bf16.msra.mxu0 %v2374_v36  ;;  %2226 = vmatpush3.bf16.msra.mxu1 %v2375_v37  ;;  %v2407_v36 = vld [vmem:[#allocation5 + $0x1b8] sm:$0xff]   ;;  %v214_v37 = vsub.s32 4, %v2597_v41 }
  0xc9   :  { %2233 = vmatprep.subr.bf16.mxu0 %v2376_v38  ;;  %2255 = vmatprep.subr.bf16.mxu1 %v2377_v39  ;;  %v222_v38 = vsub.s32 6, %v2597_v41  ;;  %v218_v39 = vsub.s32 5, %v2597_v41 }
  0xca   :  { %v215_v42 = vrot.slane %v2603_v57, %v214_v37 }
  0xcb   :  { %v223_v43 = vrot.slane %v2603_v57, %v222_v38  ;;  %v219_v44 = vrot.slane %v2603_v57, %v218_v39 }
 0x13e   :  { %v910_v50 = vpop.f32.mrb[0].mxu0  ;;  %v951_v52 = vpop.f32.mrb[0].mxu1 }
 0x13f   :  { %v911_v51 = vadd.f32 %v910_v50, %v199_v46  ;;  %v912_v53 = vpop.f32.mrb[1].mxu0  ;;  %v952_v54 = vadd.f32 %v951_v52, %v207_v47  ;;  %v953_v56 = vpop.f32.mrb[1].mxu1 }
 0x140   :  { %v913_v55 = vadd.f32 %v912_v53, %v203_v48  ;;  %v914_v58 = vpop.f32.mrb[2].mxu0  ;;  %v954_v60 = vadd.f32 %v953_v56, %v211_v49  ;;  %v955_v61 = vpop.f32.mrb[2].mxu1 }
 0x141   :  { %v1040_v59 = vmax.f32 %v911_v51, 0.0  ;;  %v915_v62 = vpop.f32.mrb[3].mxu0  ;;  %v1042_v63 = vmax.f32 %v952_v54, 0.0  ;;  %v956_v1 = vpop.f32.mrb[3].mxu1 }
 0x142   :  { %v1041_v0 = vmax.f32 %v913_v55, 0.0  ;;  %v1043_v3 = vmax.f32 %v954_v60, 0.0  ;;  %v2408_v1 = vld [vmem:[%s2712_s5] sm:$0xff]  }
 0x143   :  { %v1048_v2 = vpack.c.bf16 %v1040_v59, %v1040_v59  ;;  %v1050_v4 = vpack.c.bf16 %v1042_v63, %v1042_v63 }
 0x144   :  { %v1049_v5 = vpack.c.bf16 %v1041_v0, %v1041_v0  ;;  %v1051_v7 = vpack.c.bf16 %v1043_v3, %v1043_v3  ;;  %v2409_v3 = vld [vmem:[%s2712_s5 + $0x8] sm:$0xff]  }
 0x146   :  { %1607 = vmatprep.mubr.bf16.mxu0 %v1049_v5  ;;  %1647 = vmatprep.mubr.bf16.mxu1 %v1051_v7  ;;  %v2411_v5 = vld [vmem:[%s2712_s5 + $0x18] sm:$0xff]   ;;  %v2413_v7 = vld [vmem:[%s2712_s5 + $0x28] sm:$0xff]  }
 0x147   :  { %1608 = vmatmul.mubr.bf16.vlgmr.msra.gmra.mrb[8].mxu0 %v1048_v2  ;;  %1648 = vmatmul.mubr.bf16.vlgmr.msra.gmra.mrb[8].mxu1 %v1050_v4  ;;  %v2502_v2 = vmov 0.0   ;;  %v2410_v4 = vld [vmem:[%s2712_s5 + $0x10] sm:$0xff]  }
 0x148   :  { %2234 = vmatpush3.bf16.msra.mxu0 %v2378_v6  ;;  %2256 = vmatpush3.bf16.msra.mxu1 %v2379_v8  ;;  %v2412_v6 = vld [vmem:[%s2712_s5 + $0x20] sm:$0xff]   ;;  %v2414_v8 = vld [vmem:[%s2712_s5 + $0x30] sm:$0xff]  }
 0x149   :  { %2235 = vmatprep.subr.bf16.mxu0 %v2380_v9  ;;  %2257 = vmatprep.subr.bf16.mxu1 %v2381_v10  ;;  %v2415_v9 = vld [vmem:[%s2712_s5 + $0x38] sm:$0xff]   ;;  %v2416_v10 = vld [vmem:[%s2714_s7] sm:$0xff]  }
 0x14c   :  { %2236 = vmatpush3.bf16.msra.mxu0 %v2382_v11  ;;  %2258 = vmatpush3.bf16.msra.mxu1 %v2383_v12  ;;  %v2417_v11 = vld [vmem:[%s2714_s7 + $0x8] sm:$0xff]   ;;  %v2418_v12 = vld [vmem:[%s2714_s7 + $0x10] sm:$0xff]  }
 0x14d   :  { %2237 = vmatprep.subr.bf16.mxu0 %v2384_v14  ;;  %2259 = vmatprep.subr.bf16.mxu1 %v2385_v15  ;;  %v2419_v14 = vld [vmem:[%s2714_s7 + $0x18] sm:$0xff]   ;;  %v2420_v15 = vld [vmem:[%s2714_s7 + $0x20] sm:$0xff]  }
 0x150   :  { %2238 = vmatpush3.bf16.msra.mxu0 %v2386_v16  ;;  %2260 = vmatpush3.bf16.msra.mxu1 %v2387_v17  ;;  %v2421_v16 = vld [vmem:[%s2714_s7 + $0x28] sm:$0xff]  }
 0x151   :  { %2239 = vmatprep.subr.bf16.mxu0 %v2388_v18  ;;  %2261 = vmatprep.subr.bf16.mxu1 %v2389_v19  ;;  %v2106_v19 = vld [vmem:[%s2711_s4] ss:$0 sm:$0xff] }
 0x154   :  { %2240 = vmatpush3.bf16.msra.mxu0 %v2390_v20  ;;  %2262 = vmatpush3.bf16.msra.mxu1 %v2391_v21 }
 0x155   :  { %2241 = vmatprep.subr.bf16.mxu0 %v2392_v13  ;;  %2263 = vmatprep.subr.bf16.mxu1 %v2393_v22 }
 0x158   :  { %2242 = vmatpush3.bf16.msra.mxu0 %v2394_v23  ;;  %2264 = vmatpush3.bf16.msra.mxu1 %v2395_v24 }
 0x159   :  { %2243 = vmatprep.subr.bf16.mxu0 %v2396_v25  ;;  %2265 = vmatprep.subr.bf16.mxu1 %v2397_v26 }
 0x15c   :  { %2244 = vmatpush3.bf16.msra.mxu0 %v2398_v27  ;;  %2266 = vmatpush3.bf16.msra.mxu1 %v2399_v28 }
 0x15d   :  { %2245 = vmatprep.subr.bf16.mxu0 %v2400_v29  ;;  %2267 = vmatprep.subr.bf16.mxu1 %v2401_v30 }
 0x160   :  { %2246 = vmatpush3.bf16.msra.mxu0 %v2402_v31  ;;  %2268 = vmatpush3.bf16.msra.mxu1 %v2403_v32 }
 0x161   :  { %2247 = vmatprep.subr.bf16.mxu0 %v2404_v33  ;;  %2269 = vmatprep.subr.bf16.mxu1 %v2405_v34 }
 0x164   :  { %2248 = vmatpush3.bf16.msra.mxu0 %v2406_v35  ;;  %2270 = vmatpush3.bf16.msra.mxu1 %v2407_v36 }
 0x165   :  { %2295 = vmatprep.subr.bf16.mxu0 %v2502_v2  ;;  %2315 = vmatprep.subr.bf16.mxu1 %v2502_v2 }
 0x17e   :  { %v992_v46 = vpop.f32.mrb[4].mxu0  ;;  %v1033_v48 = vpop.f32.mrb[4].mxu1 }
 0x17f   :  { %v993_v47 = vadd.f32 %v992_v46, %v215_v42  ;;  %v994_v49 = vpop.f32.mrb[5].mxu0  ;;  %v1034_v50 = vadd.f32 %v1033_v48, %v223_v43  ;;  %v1035_v52 = vpop.f32.mrb[5].mxu1  ;;  %v2171_v46 = vld [vmem:[%s2713_s6] ss:$0 sm:$0xff]  ;;  %s2468_s6 = scalar_lea.vmem %s1969_s30, 128 }
 0x180   :  { %v995_v51 = vadd.f32 %v994_v49, %v219_v44  ;;  %v996_v53 = vpop.f32.mrb[6].mxu0  ;;  %v1036_v55 = vadd.f32 %v1035_v52, %v227_v45  ;;  %v1037_v56 = vpop.f32.mrb[6].mxu1  ;;  %v2422_v44 = vld [vmem:[%s2714_s7 + $0x30] sm:$0xff]   ;;  %v2423_v45 = vld [vmem:[%s2714_s7 + $0x38] sm:$0xff]   ;;  %p2469_p2 = scmp.ne.s32.totalorder %s1969_s30, %s2468_s6  ;;  %p2474_p4 = scmp.lt.s32.totalorder %s2468_s6, %s2468_s6 }
 0x181   :  { %v1044_v54 = vmax.f32 %v993_v47, 0.0  ;;  %v997_v41 = vpop.f32.mrb[7].mxu0  ;;  %v1046_v58 = vmax.f32 %v1034_v50, 0.0  ;;  %v1038_v60 = vpop.f32.mrb[7].mxu1 }
 0x182   :  { %v1045_v59 = vmax.f32 %v995_v51, 0.0  ;;  %v1047_v61 = vmax.f32 %v1036_v55, 0.0  ;;  %p2475_p5 = por %p2474_p4, %p2473_p3 }
 0x183   :  { %v1054_v62 = vpack.c.bf16 %v1046_v58, %v1046_v58  ;;  %v1052_v0 = vpack.c.bf16 %v1044_v54, %v1044_v54  ;;  %v2180_v54 = vld [vmem:[%s2715_s8] ss:$0 sm:$0xff] }
 0x184   :  { %v1053_v63 = vpack.c.bf16 %v1045_v59, %v1045_v59  ;;  %v1055_v57 = vpack.c.bf16 %v1047_v61, %v1047_v61  ;;  %p2476_p6 = pnand %p2475_p5, %p2469_p2 }
 0x186   :  { %1687 = vmatprep.mubr.bf16.mxu0 %v1053_v63  ;;  %1727 = vmatprep.mubr.bf16.mxu1 %v1055_v57 }
 0x187   :  { %1688 = vmatmul.mubr.bf16.vlgmr.msra.gmra.mrb[12].mxu0 %v1052_v0  ;;  %1728 = vmatmul.mubr.bf16.vlgmr.msra.gmra.mrb[12].mxu1 %v1054_v62 }
 0x188   :  { %2296 = vmatpush3.bf16.msra.mxu0 %v2408_v1  ;;  %2311 = vmatprep.mubr.msk.bf16.mxu0 %vm2503_vm0, %v2502_v2 }
 0x189   :  { %2297 = vmatprep.subr.bf16.mxu0 %v2502_v2  ;;  %2331 = vmatprep.mubr.msk.bf16.mxu1 %vm2503_vm0, %v2502_v2 }
 0x18a   :  { %2316 = vmatpush3.bf16.msra.mxu1 %v2416_v10 }
 0x18b   :  { %2317 = vmatprep.subr.bf16.mxu1 %v2502_v2 }
 0x18c   :  { %2298 = vmatpush3.bf16.msra.mxu0 %v2409_v3 }
 0x18d   :  { %2299 = vmatprep.subr.bf16.mxu0 %v2502_v2 }
 0x18e   :  { %2318 = vmatpush3.bf16.msra.mxu1 %v2417_v11 }
 0x18f   :  { %2319 = vmatprep.subr.bf16.mxu1 %v2502_v2 }
 0x190   :  { %2300 = vmatpush3.bf16.msra.mxu0 %v2410_v4 }
 0x191   :  { %2301 = vmatprep.subr.bf16.mxu0 %v2502_v2 }
 0x192   :  { %2320 = vmatpush3.bf16.msra.mxu1 %v2418_v12 }
 0x193   :  { %2321 = vmatprep.subr.bf16.mxu1 %v2502_v2 }
 0x194   :  { %2302 = vmatpush3.bf16.msra.mxu0 %v2411_v5 }
 0x195   :  { %2303 = vmatprep.subr.bf16.mxu0 %v2502_v2 }
 0x196   :  { %2322 = vmatpush3.bf16.msra.mxu1 %v2419_v14 }
 0x197   :  { %2323 = vmatprep.subr.bf16.mxu1 %v2502_v2 }
 0x198   :  { %2304 = vmatpush3.bf16.msra.mxu0 %v2412_v6 }
 0x199   :  { %2305 = vmatprep.subr.bf16.mxu0 %v2502_v2 }
 0x19a   :  { %2324 = vmatpush3.bf16.msra.mxu1 %v2420_v15 }
 0x19b   :  { %2325 = vmatprep.subr.bf16.mxu1 %v2502_v2 }
 0x19c   :  { %2306 = vmatpush3.bf16.msra.mxu0 %v2413_v7 }
 0x19d   :  { %2307 = vmatprep.subr.bf16.mxu0 %v2502_v2 }
 0x19e   :  { %2326 = vmatpush3.bf16.msra.mxu1 %v2421_v16 }
 0x19f   :  { %2327 = vmatprep.subr.bf16.mxu1 %v2502_v2 }
 0x1a0   :  { %2308 = vmatpush3.bf16.msra.mxu0 %v2414_v8 }
 0x1a1   :  { %2309 = vmatprep.subr.bf16.mxu0 %v2502_v2 }
 0x1a2   :  { %2328 = vmatpush3.bf16.msra.mxu1 %v2422_v44 }
 0x1a3   :  { %2329 = vmatprep.subr.bf16.mxu1 %v2502_v2 }
 0x1a4   :  { %2310 = vmatpush3.bf16.msra.mxu0 %v2415_v9 }
 0x1a6   :  { %2330 = vmatpush3.bf16.msra.mxu1 %v2423_v45 }
 0x21a   :  { %v2205_v17 = vpop.f32.mrb[8].mxu0  ;;  %v2227_v18 = vpop.f32.mrb[8].mxu1 }
 0x21b   :  { %v2206_v20 = vpop.f32.mrb[9].mxu0  ;;  %v2228_v13 = vpop.f32.mrb[9].mxu1 }
 0x21c   :  { %v2207_v21 = vadd.f32 %v2206_v20, %v2205_v17  ;;  %v2208_v22 = vpop.f32.mrb[10].mxu0  ;;  %v2229_v23 = vadd.f32 %v2228_v13, %v2227_v18  ;;  %v2230_v24 = vpop.f32.mrb[10].mxu1 }
 0x21d   :  { %v2209_v25 = vpop.f32.mrb[11].mxu0  ;;  %v2231_v27 = vpop.f32.mrb[11].mxu1 }
 0x21e   :  { %v1610_v26 = vadd.f32 %v2207_v21, %v2106_v19 }
 0x220   :  { %v1650_v28 = vadd.f32 %v2229_v23, %v1610_v26 }
 0x25a   :  { %v2249_v29 = vpop.f32.mrb[12].mxu0  ;;  %v2271_v30 = vpop.f32.mrb[12].mxu1 }
 0x25b   :  { %v2250_v31 = vpop.f32.mrb[13].mxu0  ;;  %v2272_v33 = vpop.f32.mrb[13].mxu1 }
 0x25c   :  { %v2251_v32 = vadd.f32 %v2250_v31, %v2249_v29  ;;  %v2252_v34 = vpop.f32.mrb[14].mxu0  ;;  %v2273_v35 = vadd.f32 %v2272_v33, %v2271_v30  ;;  %v2274_v36 = vpop.f32.mrb[14].mxu1 }
 0x25d   :  { %v2253_v37 = vpop.f32.mrb[15].mxu0  ;;  %v2275_v39 = vpop.f32.mrb[15].mxu1 }
 0x25e   :  { %v1690_v38 = vadd.f32 %v2251_v32, %v1650_v28 }
 0x260   :  { %v1730_v40 = vadd.f32 %v2273_v35, %v1690_v38 }
 0x262   :  { %v1735_v42 = vmax.f32 %v1730_v40, 0.0 }
 0x264   :  { %v1736_v43 = vpack.c.bf16 %v1735_v42, %v1735_v42 }
 0x266   :  { %2312 = vmatmul.mubr.bf16.vlgmr.msra.gmra.mrb[16].mxu0 %v1736_v43 }
 0x339   :  { %v1842_v47 = vpop.f32.mrb[16].mxu0 }
 0x33a   :  { %v1843_v48 = vadd.f32 %v2171_v46, %v1842_v47  ;;  %v2313_v49 = vpop.f32.mrb[17].mxu0 }
 0x33b   :  { %v1845_v50 = vpop.f32.mrb[18].mxu0 }
 0x33c   :  { %v1848_v51 = vmax.f32 %v1843_v48, 0.0  ;;  %v2314_v52 = vpop.f32.mrb[19].mxu0 }
 0x33e   :  { %v1849_v53 = vpack.c.bf16 %v1848_v51, %v1848_v51 }
 0x340   :  { %2332 = vmatmul.mubr.bf16.vlgmr.msra.gmra.mrb[16].mxu1 %v1849_v53 }
 0x413   :  { %v1955_v55 = vpop.f32.mrb[16].mxu1 }
 0x414   :  { %v1956_v56 = vadd.f32 %v2180_v54, %v1955_v55  ;;  %v2333_v41 = vpop.f32.mrb[17].mxu1 }
 0x415   :  { %v1958_v58 = vpop.f32.mrb[18].mxu1 }
 0x416   :  { %1961 = vst [vmem:[#allocation7] sm:$0xff] %v1956_v56  ;;  %v2334_v59 = vpop.f32.mrb[19].mxu1 }
 0x417   :  { %2479 = shalt.err (!%p2476_p6)
}
 0x418   :  { %s2480_s8 = scalar_lea.hbm %s2716_s9, 128 }
 0x419   :  { %p2481_p7 = scmp.ne.s32.totalorder %s2716_s9, %s2480_s8  ;;  %p2484_p8 = scmp.lt.u32.totalorder %s2480_s8, %s2716_s9 }
 0x41b   :  { %p2486_p9 = pnand %p2484_p8, %p2481_p7 }
 0x41d   :  { %2489 = shalt.err (!%p2486_p9)
}
 0x41e   :  { %1971 = dma.vmem_to_hbm [thread:$0]  %s1969_s30, 128, %s2716_s9, [#allocation4]  }
 0x41f   :  { %2494 = dma.done.wait [#allocation4], 128  }
 0x420   :  { %2495 = vsyncadd [#allocation4], 4294967168 }
 0x421   :  { %1975 = vsyncpa [#allocation3], 1 }
 0x422   :  { %1976 = vsyncpa [#allocation6], 1 }
 0x423   :  { %1977 = vsyncpa [#allocation4], 1 }

</bundles_post_ra>
